<compile_context>
chip_gen: v7x
topology: tpu7x:2x2x1
jax: 0.10.0
libtpu: 0.0.40
codegen_flags: <defaults>
</compile_context>

<pallas_src>
import numpy as np
import jax
import jax.numpy as jnp
from jax.experimental import pallas as pl
from jax.experimental.pallas import tpu as pltpu


# ----------------------------------------------------------------------------- utils
def _round_up(x, m):
    return (x + m - 1) // m * m


def _pick_tile(dim, unit, cap):
    """Largest balanced tile: a multiple of `unit`, <= cap, minimizing padding."""
    dim_r = _round_up(max(int(dim), 1), unit)
    if dim_r <= cap:
        return dim_r
    nblocks = -(-dim_r // cap)                       # ceil
    return _round_up(-(-dim_r // nblocks), unit)     # balanced split, still <= cap


def _choose_tiles(M, K, N):
    # f32 sublane packing -> tm multiple of 8; lane dims multiples of 128.
    # NOTE: if bf16 inputs are ever fed, tm should become a multiple of 16.
    tm = _pick_tile(M, 8, 512)
    tk = _pick_tile(K, 128, 1024)
    tn = _pick_tile(N, 128, 512)
    # v7x has 2 TensorCores: if the whole problem is a single (M, N) tile, split
    # N so both cores get a "parallel" block (free on 1-TC v5e/v6e).
    if _round_up(M, tm) == tm and _round_up(N, tn) == tn and tn % 256 == 0:
        tn //= 2
    return tm, tk, tn


def _vmem_limit_bytes(tm, tk, tn, with_acc):
    f32 = 4
    need = 2 * (tm * tk + tk * tn + tm * tn + tn) * f32   # double-buffered in/out
    if with_acc:
        need += tm * tn * f32                             # single-buffered scratch
    # Headroom for Mosaic-internal scratch; stay well inside v7x's 64 MiB VMEM.
    return min(max(need + (8 << 20), 16 << 20), 40 << 20)


# ----------------------------------------------------------------------------- kernels
def _make_dense_kernel(scale):
    """Plain Dense: accumulate x@w over the K grid axis directly into the
    resident f32 output block; apply (static) wscale and bias at the last K."""
    def kernel(x_ref, w_ref, b_ref, o_ref):
        k = pl.program_id(2)

        @pl.when(k == 0)
        def _():
            o_ref[...] = jnp.zeros_like(o_ref)

        o_ref[...] += jnp.dot(x_ref[...], w_ref[...],
                              preferred_element_type=jnp.float32)

        @pl.when(k == pl.num_programs(2) - 1)
        def _():
            acc = o_ref[...]
            if scale != 1.0:                      # static Python constant
                acc = acc * scale
            o_ref[...] = acc + b_ref[...]         # (1, tn) bias broadcasts over tm

    return kernel


def _make_maxout_kernel(scale):
    """Maxout Dense. Grid (i, j, g, k): per maxout group g, K-accumulate into a
    VMEM scratch; keep the running group-max in the resident output block; add
    bias on the last group. The pre-max tensor never goes to HBM."""
    def kernel(x_ref, w_ref, b_ref, o_ref, acc_ref):
        g = pl.program_id(2)
        k = pl.program_id(3)
        last_k = k == pl.num_programs(3) - 1

        @pl.when(k == 0)
        def _():
            acc_ref[...] = jnp.zeros_like(acc_ref)

        acc_ref[...] += jnp.dot(x_ref[...], w_ref[...],
                                preferred_element_type=jnp.float32)

        @pl.when(last_k & (g == 0))
        def _():
            yg = acc_ref[...]
            if scale != 1.0:
                yg = yg * scale
            o_ref[...] = yg

        @pl.when(last_k & (g > 0))
        def _():
            yg = acc_ref[...]
            if scale != 1.0:
                yg = yg * scale
            o_ref[...] = jnp.maximum(o_ref[...], yg)

        @pl.when(last_k & (g == pl.num_programs(2) - 1))
        def _():
            o_ref[...] = o_ref[...] + b_ref[...]

    return kernel


# ----------------------------------------------------------------------------- pallas wrappers
def _pallas_dense(x, w, bias_row, scale):
    """y = (x @ w) * scale + bias_row   (f32 accumulation in the output block)."""
    M, K = x.shape
    _, N = w.shape
    tm, tk, tn = _choose_tiles(M, K, N)
    M_pad, K_pad, N_pad = _round_up(M, tm), _round_up(K, tk), _round_up(N, tn)

    # Only materialize padded copies when the shapes actually need padding.
    x_p = x if (M == M_pad and K == K_pad) else (
        jnp.zeros((M_pad, K_pad), x.dtype).at[:M, :K].set(x))
    w_p = w if (K == K_pad and N == N_pad) else (
        jnp.zeros((K_pad, N_pad), w.dtype).at[:K, :N].set(w))
    b_p = bias_row if N == N_pad else (
        jnp.zeros((1, N_pad), bias_row.dtype).at[:, :N].set(bias_row))

    grid = (M_pad // tm, N_pad // tn, K_pad // tk)

    y_p = pl.pallas_call(
        _make_dense_kernel(scale),
        out_shape=jax.ShapeDtypeStruct((M_pad, N_pad), jnp.float32),
        grid_spec=pltpu.PrefetchScalarGridSpec(
            num_scalar_prefetch=0,
            grid=grid,
            in_specs=[
                pl.BlockSpec((tm, tk), lambda i, j, k: (i, k)),   # x tile
                pl.BlockSpec((tk, tn), lambda i, j, k: (k, j)),   # w tile
                pl.BlockSpec((1, tn), lambda i, j, k: (0, j)),    # bias (k-invariant)
            ],
            out_specs=pl.BlockSpec((tm, tn), lambda i, j, k: (i, j)),
        ),
        compiler_params=pltpu.CompilerParams(
            dimension_semantics=("parallel", "parallel", "arbitrary"),
            vmem_limit_bytes=_vmem_limit_bytes(tm, tk, tn, with_acc=False)),
    )(x_p, w_p, b_p)

    return y_p[:M, :N]


def _pallas_dense_maxout(x, w_stack, bias_row, scale):
    """y[b, j] = max_g ((x @ w_stack[g]) * scale)[b, j] + bias_row[0, j]."""
    G, K, N = w_stack.shape
    M, _ = x.shape
    tm, tk, tn = _choose_tiles(M, K, N)
    M_pad, K_pad, N_pad = _round_up(M, tm), _round_up(K, tk), _round_up(N, tn)

    x_p = x if (M == M_pad and K == K_pad) else (
        jnp.zeros((M_pad, K_pad), x.dtype).at[:M, :K].set(x))
    w_p = w_stack if (K == K_pad and N == N_pad) else (
        jnp.zeros((G, K_pad, N_pad), w_stack.dtype).at[:, :K, :N].set(w_stack))
    b_p = bias_row if N == N_pad else (
        jnp.zeros((1, N_pad), bias_row.dtype).at[:, :N].set(bias_row))

    grid = (M_pad // tm, N_pad // tn, G, K_pad // tk)

    y_p = pl.pallas_call(
        _make_maxout_kernel(scale),
        out_shape=jax.ShapeDtypeStruct((M_pad, N_pad), jnp.float32),
        grid_spec=pltpu.PrefetchScalarGridSpec(
            num_scalar_prefetch=0,
            grid=grid,
            in_specs=[
                pl.BlockSpec((tm, tk), lambda i, j, g, k: (i, k)),        # x tile
                pl.BlockSpec((None, tk, tn), lambda i, j, g, k: (g, k, j)),  # W_g tile
                pl.BlockSpec((1, tn), lambda i, j, g, k: (0, j)),         # bias
            ],
            out_specs=pl.BlockSpec((tm, tn), lambda i, j, g, k: (i, j)),
            scratch_shapes=[pltpu.VMEM((tm, tn), jnp.float32)],           # per-group acc
        ),
        compiler_params=pltpu.CompilerParams(
            dimension_semantics=("parallel", "parallel", "arbitrary", "arbitrary"),
            vmem_limit_bytes=_vmem_limit_bytes(tm, tk, tn, with_acc=True)),
    )(x_p, w_p, b_p)

    return y_p[:M, :N]


# ----------------------------------------------------------------------------- public forward
def dense_forward(x, weight, bias=None, *, wscale=None, out_ch=None, maxout_ch=0,
                  force_pallas=False):
    """Pallas port of leras Dense.forward.

    x:      (..., in_ch) float32
    weight: (in_ch, out_ch) or (in_ch, out_ch * maxout_ch) float32
    bias:   (out_ch,) float32 or None
    wscale: static Python / numpy scalar (he_std) or None
    """
    x = jnp.asarray(x)
    weight = jnp.asarray(weight)
    in_ch = weight.shape[0]
    lead = x.shape[:-1]
    x2 = x.reshape(-1, in_ch)
    M, K = x2.shape

    # wscale is a per-layer compile-time constant (he_std) -> fold it into the
    # kernel epilogue instead of materializing `weight * wscale` in HBM.
    scale = 1.0
    if wscale is not None:
        try:
            scale = float(wscale)
        except Exception:
            # TODO(synk): non-static (traced) wscale; scale the much smaller
            # activation instead of the weight -- exactly equivalent semantics.
            x2 = x2 * jnp.asarray(wscale, x2.dtype)

    if maxout_ch > 1:
        assert out_ch is not None, "out_ch is required when maxout_ch > 1"
        n_out = out_ch
    else:
        n_out = weight.shape[1]

    bias_row = (jnp.asarray(bias, jnp.float32).reshape(1, n_out) if bias is not None
                else jnp.zeros((1, n_out), jnp.float32))

    # Tiny problems: per-step pipeline overhead + padding dwarf the matmul; let
    # XLA's fused dot handle them.
    if not force_pallas and M * K * weight.shape[1] < 128 * 128 * 256:
        w = weight if scale == 1.0 else weight * jnp.asarray(scale, weight.dtype)
        y = x2 @ w
        if maxout_ch > 1:
            y = y.reshape(-1, n_out, maxout_ch).max(axis=-1)
        y = y + bias_row
    elif maxout_ch > 1:
        # Split W into its maxout groups once: (in_ch, out_ch*G) -> (G, in_ch, out_ch).
        # (In a real model this restride is done once per weight, not per call.)
        w_stack = jnp.transpose(weight.reshape(K, n_out, maxout_ch), (2, 0, 1))
        y = _pallas_dense_maxout(x2, w_stack, bias_row, scale)
    else:
        y = _pallas_dense(x2, weight, bias_row, scale)

    y = y.astype(x.dtype)
    if maxout_ch > 1:
        return y                      # torch's view(-1, out_ch, m) flattens leading dims
    return y.reshape(*lead, n_out)


def _xavier_uniform(key, shape, dtype=jnp.float32):
    fan_in, fan_out = shape[0], shape[1]
    bound = float(np.sqrt(6.0 / (fan_in + fan_out)))
    return jax.random.uniform(key, shape, dtype, minval=-bound, maxval=bound)


# ----------------------------------------------------------------------------- smoke tests
if __name__ == "__main__":
    key = jax.random.PRNGKey(0)
    k_x1, k_w1, k_x2, k_w2, k_b2, k_x3, k_w3 = jax.random.split(key, 7)

    # 1) default config (use_bias=True, no wscale, no maxout), tile-aligned
    #    shapes -> Pallas path with zero padding copies.
    batch, in_ch, out_ch = 128, 256, 384
    w1 = _xavier_uniform(k_w1, (in_ch, out_ch))
    b1 = jnp.zeros((out_ch,), jnp.float32)
    x1 = jax.random.normal(k_x1, (batch, in_ch), jnp.float32)
    y1 = jax.block_until_ready(dense_forward(x1, w1, b1))
    y1_ref = np.asarray(x1) @ np.asarray(w1) + np.asarray(b1)[None, :]
    assert y1.shape == (batch, out_ch)
    np.testing.assert_allclose(np.asarray(y1), y1_ref, rtol=1e-4, atol=1e-4)

    # 2) use_wscale + maxout, unaligned shapes -> padded fused-maxout Pallas path.
    batch2, in_ch2, out_ch2, m = 72, 96, 80, 2
    w2 = jax.random.normal(k_w2, (in_ch2, out_ch2 * m), jnp.float32)
    b2 = jax.random.normal(k_b2, (out_ch2,), jnp.float32)
    x2 = jax.random.normal(k_x2, (batch2, in_ch2), jnp.float32)
    he_std = float(1.0 / np.sqrt(in_ch2))                      # use_wscale init
    y2 = jax.block_until_ready(
        dense_forward(x2, w2, b2, wscale=he_std, out_ch=out_ch2, maxout_ch=m,
                      force_pallas=True))
    y2_ref = ((np.asarray(x2) @ (np.asarray(w2) * np.float32(he_std)))
              .reshape(-1, out_ch2, m).max(-1) + np.asarray(b2)[None, :])
    assert y2.shape == (batch2, out_ch2)
    np.testing.assert_allclose(np.asarray(y2), y2_ref, rtol=1e-4, atol=1e-4)

    # 3) tiny problem -> XLA dot fallback (Pallas overhead would dominate).
    x3 = jax.random.normal(k_x3, (8, 32), jnp.float32)
    w3 = _xavier_uniform(k_w3, (32, 64))
    b3 = jnp.zeros((64,), jnp.float32)
    y3 = jax.block_until_ready(dense_forward(x3, w3, b3))
    y3_ref = np.asarray(x3) @ np.asarray(w3) + np.asarray(b3)[None, :]
    np.testing.assert_allclose(np.asarray(y3), y3_ref, rtol=1e-4, atol=1e-4)

    print("KERNEL_OK")
</pallas_src>

<mosaic_0001>
module attributes {stable_mosaic.version = 11 : i64} {
  func.func @kernel(%arg0: i32, %arg1: i32, %arg2: i32, %arg3: memref<128x256xf32, #tpu.memory_space<vmem>>, %arg4: memref<256x384xf32, #tpu.memory_space<vmem>>, %arg5: memref<1x384xf32, #tpu.memory_space<vmem>>, %arg6: memref<128x384xf32, #tpu.memory_space<vmem>>) attributes {dimension_semantics = [#tpu.dimension_semantics<parallel>, #tpu.dimension_semantics<parallel>, #tpu.dimension_semantics<arbitrary>], iteration_bounds = array<i64: 1, 1, 1>, scalar_prefetch = 0 : i64, scratch_operands = 0 : i64, tpu.core_type = #tpu.core_type<tc>, window_params = [{transform_indices = @transform_0, window_bounds = array<i64: 128, 256>}, {transform_indices = @transform_1, window_bounds = array<i64: 256, 384>}, {transform_indices = @transform_2, window_bounds = array<i64: 1, 384>}, {transform_indices = @transform_3, window_bounds = array<i64: 128, 384>}]} {
    %c0_i32 = arith.constant 0 : i32
    %0 = arith.cmpi eq, %arg2, %c0_i32 : i32
    %1 = arith.extui %0 : i1 to i32
    %c0_i32_0 = arith.constant 0 : i32
    %2 = arith.cmpi ne, %1, %c0_i32_0 : i32
    scf.if %2 {
      %cst_10 = arith.constant 0.000000e+00 : f32
      %12 = vector.broadcast %cst_10 : f32 to vector<128x384xf32>
      %c0_11 = arith.constant 0 : index
      %c0_12 = arith.constant 0 : index
      %13 = vector.load %arg6[%c0_11, %c0_12] : memref<128x384xf32, #tpu.memory_space<vmem>>, vector<128x384xf32>
      tpu.vector_store %arg6[%c0_11, %c0_12], %12 {strides = array<i32>} : memref<128x384xf32, #tpu.memory_space<vmem>>, vector<128x384xf32>,
    } else {
    }
    %c0 = arith.constant 0 : index
    %c0_1 = arith.constant 0 : index
    %3 = vector.load %arg6[%c0, %c0_1] : memref<128x384xf32, #tpu.memory_space<vmem>>, vector<128x384xf32>
    %c0_2 = arith.constant 0 : index
    %c0_3 = arith.constant 0 : index
    %4 = vector.load %arg3[%c0_2, %c0_3] : memref<128x256xf32, #tpu.memory_space<vmem>>, vector<128x256xf32>
    %c0_4 = arith.constant 0 : index
    %c0_5 = arith.constant 0 : index
    %5 = vector.load %arg4[%c0_4, %c0_5] : memref<256x384xf32, #tpu.memory_space<vmem>>, vector<256x384xf32>
    %cst = arith.constant dense<0.000000e+00> : vector<128x384xf32>
    %6 = tpu.matmul %4, %5, %cst {dimension_numbers = #tpu.dot_dimension_numbers<[1], [0], [0], [1], [0, 0, 1, 1], [], []>} : vector<128x256xf32>, vector<256x384xf32>, vector<128x384xf32> -> vector<128x384xf32>
    %7 = arith.addf %3, %6 : vector<128x384xf32>
    %c0_6 = arith.constant 0 : index
    %c0_7 = arith.constant 0 : index
    %8 = vector.load %arg6[%c0_6, %c0_7] : memref<128x384xf32, #tpu.memory_space<vmem>>, vector<128x384xf32>
    tpu.vector_store %arg6[%c0_6, %c0_7], %7 {strides = array<i32>} : memref<128x384xf32, #tpu.memory_space<vmem>>, vector<128x384xf32>,
    %c0_i32_8 = arith.constant 0 : i32
    %9 = arith.cmpi eq, %arg2, %c0_i32_8 : i32
    %10 = arith.extui %9 : i1 to i32
    %c0_i32_9 = arith.constant 0 : i32
    %11 = arith.cmpi ne, %10, %c0_i32_9 : i32
    scf.if %11 {
      %c0_10 = arith.constant 0 : index
      %c0_11 = arith.constant 0 : index
      %12 = vector.load %arg6[%c0_10, %c0_11] : memref<128x384xf32, #tpu.memory_space<vmem>>, vector<128x384xf32>
      %c0_12 = arith.constant 0 : index
      %c0_13 = arith.constant 0 : index
      %13 = vector.load %arg5[%c0_12, %c0_13] : memref<1x384xf32, #tpu.memory_space<vmem>>, vector<1x384xf32>
      %14 = vector.broadcast %13 : vector<1x384xf32> to vector<128x384xf32>
      %15 = arith.addf %12, %14 : vector<128x384xf32>
      %c0_14 = arith.constant 0 : index
      %c0_15 = arith.constant 0 : index
      %16 = vector.load %arg6[%c0_14, %c0_15] : memref<128x384xf32, #tpu.memory_space<vmem>>, vector<128x384xf32>
      tpu.vector_store %arg6[%c0_14, %c0_15], %15 {strides = array<i32>} : memref<128x384xf32, #tpu.memory_space<vmem>>, vector<128x384xf32>,
    } else {
    }
    return
  }
  func.func @transform_0(%arg0: i32, %arg1: i32, %arg2: i32) -> (i32, i32) {
    %c0_i32 = arith.constant 0 : i32
    return %arg0, %arg2 : i32, i32
  }
  func.func @transform_1(%arg0: i32, %arg1: i32, %arg2: i32) -> (i32, i32) {
    %c0_i32 = arith.constant 0 : i32
    return %arg2, %arg1 : i32, i32
  }
  func.func @transform_2(%arg0: i32, %arg1: i32, %arg2: i32) -> (i32, i32) {
    %c0_i32 = arith.constant 0 : i32
    %c0_i32_0 = arith.constant 0 : i32
    return %c0_i32, %arg1 : i32, i32
  }
  func.func @transform_3(%arg0: i32, %arg1: i32, %arg2: i32) -> (i32, i32) {
    %c0_i32 = arith.constant 0 : i32
    return %arg0, %arg1 : i32, i32
  }
}

</mosaic_0001>

<bundles_post_ra>
// kernel: tpu_custom_call.1
= control target key start
LH: loop header
LB: loop body
LE: loop exit
PB: predicated region body
PF: predicated region fallthrough
CT: control target
= control target key end

     0   :  { %8 = vsyncpa [#allocation3], 0  ;;  %s1237_s0 = inlined_call_operand.hbm [shape: f32[128,256], index: 0, kind: input, shape index: {}]   ;;  %s1238_s1 = inlined_call_operand.hbm [shape: f32[256,384], index: 1, kind: input, shape index: {}]   ;;  %s1239_s2 = inlined_call_operand.vmem [shape: f32[1,384], index: 2, kind: input, shape index: {}]   ;;  %s1240_s3 = inlined_call_operand.hbm [shape: f32[128,384], index: 3, kind: output, shape index: {}]  }
   0x1   :  { %9 = vsyncpa [#allocation6], 0 }
   0x2   :  { %10 = vsyncpa [#allocation4], 0  ;;  %s1111_s12 = smov [#allocation2]   ;;  %s1039_s16 = scalar_lea.hbm %s1237_s0, 4096 }
   0x3   :  { %s16_s13 = sshll.u32 %s1111_s12, 4  ;;  %p1040_p0 = scmp.ne.s32.totalorder %s1237_s0, %s1039_s16  ;;  %s17_s13 = int_to_ptr.vmem [resolvable:$true] %s16_s13 }
   0x4   :  { %p1043_p1 = scmp.lt.u32.totalorder %s1039_s16, %s1237_s0 }
   0x6   :  { %p1045_p2 = pnand %p1043_p1, %p1040_p0 }
   0x8   :  { %1048 = shalt.err (!%p1045_p2)
}
   0x9   :  { %s1049_s21 = scalar_lea.vmem %s17_s13, 4096  ;;  %p1054_p4 = scmp.lt.s32.totalorder %s17_s13, %s17_s13 }
   0xa   :  { %p1050_p3 = scmp.ne.s32.totalorder %s17_s13, %s1049_s21  ;;  %p1055_p5 = scmp.lt.s32.totalorder %s1049_s21, %s1049_s21 }
   0xc   :  { %p1056_p6 = por %p1055_p5, %p1054_p4 }
   0xe   :  { %p1057_p7 = pnand %p1056_p6, %p1050_p3 }
  0x10   :  { %1060 = shalt.err (!%p1057_p7)
}
  0x11   :  { %s1112_s22 = smov 256   ;;  %s1113_s23 = smov 16  }
  0x12   :  { %22 = dma.hbm_to_vmem [thread:$0]  %s1237_s0, 4096, %s17_s13, [#allocation3], %s1112_s22, %s1112_s22, %s1113_s23  }
  0x13   :  { %s1114_s26 = smov [#allocation5]   ;;  %s1061_s30 = scalar_lea.hbm %s1238_s1, 12288 }
  0x14   :  { %s28_s27 = sshll.u32 %s1114_s26, 4  ;;  %p1062_p8 = scmp.ne.s32.totalorder %s1238_s1, %s1061_s30  ;;  %s29_s27 = int_to_ptr.vmem [resolvable:$true] %s28_s27 }
  0x15   :  { %p1065_p9 = scmp.lt.u32.totalorder %s1061_s30, %s1238_s1 }
  0x17   :  { %p1067_p10 = pnand %p1065_p9, %p1062_p8 }
  0x19   :  { %1070 = shalt.err (!%p1067_p10)
}
  0x1a   :  { %s1071_s8 = scalar_lea.vmem %s29_s27, 12288  ;;  %p1076_p12 = scmp.lt.s32.totalorder %s29_s27, %s29_s27 }
  0x1b   :  { %p1072_p11 = scmp.ne.s32.totalorder %s29_s27, %s1071_s8  ;;  %p1077_p13 = scmp.lt.s32.totalorder %s1071_s8, %s1071_s8 }
  0x1d   :  { %p1078_p0 = por %p1077_p13, %p1076_p12 }
  0x1f   :  { %p1079_p1 = pnand %p1078_p0, %p1072_p11 }
  0x21   :  { %1082 = shalt.err (!%p1079_p1)
}
  0x22   :  { %s1115_s0 = smov 384   ;;  %s1116_s9 = smov 24  }
  0x23   :  { %34 = dma.hbm_to_vmem [thread:$0]  %s1238_s1, 12288, %s29_s27, [#allocation6], %s1115_s0, %s1115_s0, %s1116_s9  }
  0x24   :  { %1105 = dma.done.wait [#allocation3], 4096  }
  0x25   :  { %1106 = vsyncadd [#allocation3], 4294963200 }
  0x26   :  { %1107 = dma.done.wait [#allocation6], 12288  }
  0x27   :  { %1108 = vsyncadd [#allocation6], 4294955008  ;;  %v176_v0 = vld [vmem:[#allocation5 + $0x8] sm:$0xff]  ;;  %v179_v1 = vld [vmem:[#allocation5 + $0x20] sm:$0xff] }
  0x28   :  { %v175_v2 = vld [vmem:[#allocation5] sm:$0xff]  ;;  %v935_v3 = vpack.c.bf16 %v179_v1, %v176_v0  ;;  %v178_v4 = vld [vmem:[#allocation5 + $0x18] sm:$0xff]  ;;  %v185_v6 = vld [vmem:[#allocation5 + $0x50] sm:$0xff] }
  0x29   :  { %v182_v5 = vld [vmem:[#allocation5 + $0x38] sm:$0xff]  ;;  %v937_v7 = vpack.c.bf16 %v178_v4, %v175_v2  ;;  %v181_v9 = vld [vmem:[#allocation5 + $0x30] sm:$0xff]  ;;  %v184_v10 = vld [vmem:[#allocation5 + $0x48] sm:$0xff] }
  0x2a   :  { %v939_v8 = vpack.c.bf16 %v185_v6, %v182_v5  ;;  %v188_v11 = vld [vmem:[#allocation5 + $0x68] sm:$0xff]  ;;  %936 = vmatprep.subr.bf16.mxu0 %v935_v3  ;;  %v191_v12 = vld [vmem:[#allocation5 + $0x80] sm:$0xff]  ;;  %v941_v13 = vpack.c.bf16 %v184_v10, %v181_v9  ;;  %v190_v16 = vld [vmem:[#allocation5 + $0x78] sm:$0xff] }
  0x2b   :  { %938 = vmatpush1.bf16.msra.mxu0 %v937_v7  ;;  %v943_v14 = vpack.c.bf16 %v191_v12, %v188_v11  ;;  %v187_v15 = vld [vmem:[#allocation5 + $0x60] sm:$0xff]  ;;  %v194_v17 = vld [vmem:[#allocation5 + $0x98] sm:$0xff]  ;;  %v197_v18 = vld [vmem:[#allocation5 + $0xb0] sm:$0xff] }
  0x2c   :  { %940 = vmatprep.subr.bf16.mxu0 %v939_v8  ;;  %v945_v19 = vpack.c.bf16 %v190_v16, %v187_v15  ;;  %v947_v20 = vpack.c.bf16 %v197_v18, %v194_v17  ;;  %v193_v21 = vld [vmem:[#allocation5 + $0x90] sm:$0xff]  ;;  %v196_v22 = vld [vmem:[#allocation5 + $0xa8] sm:$0xff]  ;;  %v203_v24 = vld [vmem:[#allocation5 + $0xe0] sm:$0xff] }
  0x2d   :  { %v200_v23 = vld [vmem:[#allocation5 + $0xc8] sm:$0xff]  ;;  %v225_v25 = vld [vmem:[#allocation5 + $0x190] sm:$0xff]  ;;  %v949_v29 = vpack.c.bf16 %v196_v22, %v193_v21  ;;  %v199_v30 = vld [vmem:[#allocation5 + $0xc0] sm:$0xff] }
  0x2e   :  { %v228_v26 = vld [vmem:[#allocation5 + $0x1a8] sm:$0xff]  ;;  %v177_v27 = vld [vmem:[#allocation5 + $0x10] sm:$0xff]  ;;  %v202_v31 = vld [vmem:[#allocation5 + $0xd8] sm:$0xff]  ;;  %v951_v34 = vpack.c.bf16 %v203_v24, %v200_v23 }
  0x2f   :  { %942 = vmatpush1.bf16.msra.mxu0 %v941_v13  ;;  %v180_v28 = vld [vmem:[#allocation5 + $0x28] sm:$0xff]  ;;  %v999_v32 = vpack.c.bf16 %v228_v26, %v225_v25  ;;  %v206_v35 = vld [vmem:[#allocation5 + $0xf8] sm:$0xff]  ;;  %v231_v36 = vld [vmem:[#allocation5 + $0x1c0] sm:$0xff]  ;;  %v953_v43 = vpack.c.bf16 %v202_v31, %v199_v30 }
  0x30   :  { %944 = vmatprep.subr.bf16.mxu0 %v943_v14  ;;  %v1001_v33 = vpack.c.bf16 %v180_v28, %v177_v27  ;;  %v234_v37 = vld [vmem:[#allocation5 + $0x1d8] sm:$0xff]  ;;  %v209_v38 = vld [vmem:[#allocation5 + $0x110] sm:$0xff]  ;;  %v183_v40 = vld [vmem:[#allocation5 + $0x40] sm:$0xff] }
  0x31   :  { %1000 = vmatprep.subr.bf16.mxu1 %v999_v32  ;;  %v1003_v39 = vpack.c.bf16 %v234_v37, %v231_v36  ;;  %v186_v41 = vld [vmem:[#allocation5 + $0x58] sm:$0xff]  ;;  %v237_v44 = vld [vmem:[#allocation5 + $0x1f0] sm:$0xff]  ;;  %v240_v45 = vld [vmem:[#allocation5 + $0x208] sm:$0xff]  ;;  %v955_v47 = vpack.c.bf16 %v209_v38, %v206_v35 }
  0x32   :  { %1002 = vmatpush3.bf16.msra.mxu1 %v1001_v33  ;;  %v1005_v42 = vpack.c.bf16 %v186_v41, %v183_v40  ;;  %v189_v46 = vld [vmem:[#allocation5 + $0x70] sm:$0xff]  ;;  %v208_v49 = vld [vmem:[#allocation5 + $0x108] sm:$0xff]  ;;  %v1007_v50 = vpack.c.bf16 %v240_v45, %v237_v44  ;;  %v215_v53 = vld [vmem:[#allocation5 + $0x140] sm:$0xff] }
  0x33   :  { %946 = vmatpush1.bf16.msra.mxu0 %v945_v19  ;;  %1004 = vmatprep.subr.bf16.mxu1 %v1003_v39  ;;  %v205_v48 = vld [vmem:[#allocation5 + $0xf0] sm:$0xff]  ;;  %v192_v51 = vld [vmem:[#allocation5 + $0x88] sm:$0xff]  ;;  %v243_v54 = vld [vmem:[#allocation5 + $0x220] sm:$0xff] }
  0x34   :  { %948 = vmatprep.subr.bf16.mxu0 %v947_v20  ;;  %v212_v52 = vld [vmem:[#allocation5 + $0x128] sm:$0xff]  ;;  %v1009_v55 = vpack.c.bf16 %v192_v51, %v189_v46  ;;  %v246_v56 = vld [vmem:[#allocation5 + $0x238] sm:$0xff]  ;;  %v957_v57 = vpack.c.bf16 %v208_v49, %v205_v48  ;;  %v211_v58 = vld [vmem:[#allocation5 + $0x120] sm:$0xff] }
  0x35   :  { %v1011_v59 = vpack.c.bf16 %v246_v56, %v243_v54  ;;  %v195_v60 = vld [vmem:[#allocation5 + $0xa0] sm:$0xff]  ;;  %v198_v61 = vld [vmem:[#allocation5 + $0xb8] sm:$0xff]  ;;  %v959_v62 = vpack.c.bf16 %v215_v53, %v212_v52  ;;  %v249_v0 = vld [vmem:[#allocation5 + $0x250] sm:$0xff] }
  0x36   :  { %1006 = vmatpush3.bf16.msra.mxu1 %v1005_v42  ;;  %v214_v63 = vld [vmem:[#allocation5 + $0x138] sm:$0xff]  ;;  %v252_v1 = vld [vmem:[#allocation5 + $0x268] sm:$0xff]  ;;  %v221_v3 = vld [vmem:[#allocation5 + $0x170] sm:$0xff]  ;;  %v1013_v4 = vpack.c.bf16 %v198_v61, %v195_v60 }
  0x37   :  { %950 = vmatpush1.bf16.msra.mxu0 %v949_v29  ;;  %1008 = vmatprep.subr.bf16.mxu1 %v1007_v50  ;;  %v218_v2 = vld [vmem:[#allocation5 + $0x158] sm:$0xff]  ;;  %v961_v5 = vpack.c.bf16 %v214_v63, %v211_v58  ;;  %v217_v6 = vld [vmem:[#allocation5 + $0x150] sm:$0xff]  ;;  %v1015_v7 = vpack.c.bf16 %v252_v1, %v249_v0  ;;  %v204_v9 = vld [vmem:[#allocation5 + $0xe8] sm:$0xff] }
  0x38   :  { %952 = vmatprep.subr.bf16.mxu0 %v951_v34  ;;  %v201_v8 = vld [vmem:[#allocation5 + $0xd0] sm:$0xff]  ;;  %v963_v10 = vpack.c.bf16 %v221_v3, %v218_v2  ;;  %v220_v11 = vld [vmem:[#allocation5 + $0x168] sm:$0xff]  ;;  %v255_v12 = vld [vmem:[#allocation5 + $0x280] sm:$0xff] }
  0x39   :  { %v258_v13 = vld [vmem:[#allocation5 + $0x298] sm:$0xff]  ;;  %v224_v14 = vld [vmem:[#allocation5 + $0x188] sm:$0xff]  ;;  %v227_v15 = vld [vmem:[#allocation5 + $0x1a0] sm:$0xff]  ;;  %v1017_v16 = vpack.c.bf16 %v204_v9, %v201_v8  ;;  %v965_v17 = vpack.c.bf16 %v220_v11, %v217_v6 }
  0x3a   :  { %1010 = vmatpush3.bf16.msra.mxu1 %v1009_v55  ;;  %v223_v18 = vld [vmem:[#allocation5 + $0x180] sm:$0xff]  ;;  %v1019_v19 = vpack.c.bf16 %v258_v13, %v255_v12  ;;  %v210_v21 = vld [vmem:[#allocation5 + $0x118] sm:$0xff]  ;;  %v967_v22 = vpack.c.bf16 %v227_v15, %v224_v14  ;;  %v261_v24 = vld [vmem:[#allocation5 + $0x2b0] sm:$0xff] }
  0x3b   :  { %954 = vmatpush1.bf16.msra.mxu0 %v953_v43  ;;  %1012 = vmatprep.subr.bf16.mxu1 %v1011_v59  ;;  %v207_v20 = vld [vmem:[#allocation5 + $0x100] sm:$0xff]  ;;  %v226_v23 = vld [vmem:[#allocation5 + $0x198] sm:$0xff]  ;;  %v264_v25 = vld [vmem:[#allocation5 + $0x2c8] sm:$0xff] }
  0x3c   :  { %956 = vmatprep.subr.bf16.mxu0 %v955_v47  ;;  %v230_v26 = vld [vmem:[#allocation5 + $0x1b8] sm:$0xff]  ;;  %v233_v27 = vld [vmem:[#allocation5 + $0x1d0] sm:$0xff]  ;;  %v1021_v28 = vpack.c.bf16 %v210_v21, %v207_v20  ;;  %v144_v29 = vld [vmem:[#allocation2 + $0x8] sm:$0xff]  ;;  %v969_v30 = vpack.c.bf16 %v226_v23, %v223_v18  ;;  %v1023_v32 = vpack.c.bf16 %v264_v25, %v261_v24 }
  0x3d   :  { %v229_v31 = vld [vmem:[#allocation5 + $0x1b0] sm:$0xff]  ;;  %v216_v34 = vld [vmem:[#allocation5 + $0x148] sm:$0xff]  ;;  %v971_v35 = vpack.c.bf16 %v233_v27, %v230_v26  ;;  %v267_v37 = vld [vmem:[#allocation5 + $0x2e0] sm:$0xff]  ;;  %496 = vmatprep.mubr.f32.mxu1 %v144_v29  ;;  %335 = vmatprep.mubr.f32.mxu0 %v144_v29 }
  0x3e   :  { %1014 = vmatpush3.bf16.msra.mxu1 %v1013_v4  ;;  %v213_v33 = vld [vmem:[#allocation5 + $0x130] sm:$0xff]  ;;  %v232_v36 = vld [vmem:[#allocation5 + $0x1c8] sm:$0xff]  ;;  %v270_v38 = vld [vmem:[#allocation5 + $0x2f8] sm:$0xff] }
  0x3f   :  { %958 = vmatpush1.bf16.msra.mxu0 %v957_v57  ;;  %1016 = vmatprep.subr.bf16.mxu1 %v1015_v7  ;;  %v236_v39 = vld [vmem:[#allocation5 + $0x1e8] sm:$0xff]  ;;  %v239_v40 = vld [vmem:[#allocation5 + $0x200] sm:$0xff]  ;;  %v1025_v41 = vpack.c.bf16 %v216_v34, %v213_v33  ;;  %v973_v42 = vpack.c.bf16 %v232_v36, %v229_v31  ;;  %v1027_v43 = vpack.c.bf16 %v270_v38, %v267_v37  ;;  %v222_v45 = vld [vmem:[#allocation5 + $0x178] sm:$0xff] }
  0x40   :  { %960 = vmatprep.subr.bf16.mxu0 %v959_v62  ;;  %v219_v44 = vld [vmem:[#allocation5 + $0x160] sm:$0xff]  ;;  %v975_v46 = vpack.c.bf16 %v239_v40, %v236_v39  ;;  %v238_v48 = vld [vmem:[#allocation5 + $0x1f8] sm:$0xff]  ;;  %v245_v50 = vld [vmem:[#allocation5 + $0x230] sm:$0xff] }
  0x41   :  { %v235_v47 = vld [vmem:[#allocation5 + $0x1e0] sm:$0xff]  ;;  %v242_v49 = vld [vmem:[#allocation5 + $0x218] sm:$0xff]  ;;  %v1029_v51 = vpack.c.bf16 %v222_v45, %v219_v44  ;;  %v241_v54 = vld [vmem:[#allocation5 + $0x210] sm:$0xff] }
  0x42   :  { %1018 = vmatpush3.bf16.msra.mxu1 %v1017_v16  ;;  %v977_v52 = vpack.c.bf16 %v238_v48, %v235_v47  ;;  %v979_v53 = vpack.c.bf16 %v245_v50, %v242_v49  ;;  %v244_v55 = vld [vmem:[#allocation5 + $0x228] sm:$0xff]  ;;  %v251_v57 = vld [vmem:[#allocation5 + $0x260] sm:$0xff]  ;;  %v146_v60 = vld [vmem:[#allocation2 + $0x18] sm:$0xff]  ;;  %v726_v48 = vlaneseq }
  0x43   :  { %962 = vmatpush1.bf16.msra.mxu0 %v961_v5  ;;  %1020 = vmatprep.subr.bf16.mxu1 %v1019_v19  ;;  %v248_v56 = vld [vmem:[#allocation5 + $0x248] sm:$0xff]  ;;  %v143_v58 = vld [vmem:[#allocation2] sm:$0xff]  ;;  %v981_v59 = vpack.c.bf16 %v244_v55, %v241_v54  ;;  %v250_v63 = vld [vmem:[#allocation5 + $0x258] sm:$0xff] }
  0x44   :  { %964 = vmatprep.subr.bf16.mxu0 %v963_v10  ;;  %v983_v61 = vpack.c.bf16 %v251_v57, %v248_v56  ;;  %v247_v62 = vld [vmem:[#allocation5 + $0x240] sm:$0xff]  ;;  %v254_v0 = vld [vmem:[#allocation5 + $0x278] sm:$0xff]  ;;  %v257_v1 = vld [vmem:[#allocation5 + $0x290] sm:$0xff]  ;;  %v727_v49 = vshrl.u32 %v726_v48, 7 }
  0x45   :  { %v145_v2 = vld [vmem:[#allocation2 + $0x10] sm:$0xff]  ;;  %v985_v3 = vpack.c.bf16 %v250_v63, %v247_v62  ;;  %v148_v4 = vld [vmem:[#allocation2 + $0x28] sm:$0xff]  ;;  %v987_v5 = vpack.c.bf16 %v257_v1, %v254_v0  ;;  %v263_v9 = vld [vmem:[#allocation5 + $0x2c0] sm:$0xff] }
  0x46   :  { %1022 = vmatpush3.bf16.msra.mxu1 %v1021_v28  ;;  %v253_v6 = vld [vmem:[#allocation5 + $0x270] sm:$0xff]  ;;  %v256_v7 = vld [vmem:[#allocation5 + $0x288] sm:$0xff]  ;;  %v147_v10 = vld [vmem:[#allocation2 + $0x20] sm:$0xff]  ;;  %v736_v50 = vsub.s32 2, %v727_v49 }
  0x47   :  { %966 = vmatpush1.bf16.msra.mxu0 %v965_v17  ;;  %1024 = vmatprep.subr.bf16.mxu1 %v1023_v32  ;;  %v260_v8 = vld [vmem:[#allocation5 + $0x2a8] sm:$0xff]  ;;  %v989_v11 = vpack.c.bf16 %v256_v7, %v253_v6  ;;  %v150_v12 = vld [vmem:[#allocation2 + $0x38] sm:$0xff]  ;;  %v259_v14 = vld [vmem:[#allocation5 + $0x2a0] sm:$0xff]  ;;  %v732_v6 = vsub.s32 1, %v727_v49 }
  0x48   :  { %968 = vmatprep.subr.bf16.mxu0 %v967_v22  ;;  %v991_v13 = vpack.c.bf16 %v263_v9, %v260_v8  ;;  %v262_v15 = vld [vmem:[#allocation5 + $0x2b8] sm:$0xff]  ;;  %v269_v17 = vld [vmem:[#allocation5 + $0x2f0] sm:$0xff]  ;;  %v152_v20 = vld [vmem:[#allocation2 + $0x48] sm:$0xff] }
  0x49   :  { %v266_v16 = vld [vmem:[#allocation5 + $0x2d8] sm:$0xff]  ;;  %v149_v18 = vld [vmem:[#allocation2 + $0x30] sm:$0xff]  ;;  %v993_v19 = vpack.c.bf16 %v262_v15, %v259_v14  ;;  %v268_v23 = vld [vmem:[#allocation5 + $0x2e8] sm:$0xff] }
  0x4a   :  { %1026 = vmatpush3.bf16.msra.mxu1 %v1025_v41  ;;  %v995_v21 = vpack.c.bf16 %v269_v17, %v266_v16  ;;  %v265_v22 = vld [vmem:[#allocation5 + $0x2d0] sm:$0xff]  ;;  %v151_v24 = vld [vmem:[#allocation2 + $0x40] sm:$0xff]  ;;  %v154_v26 = vld [vmem:[#allocation2 + $0x58] sm:$0xff] }
  0x4b   :  { %970 = vmatpush1.bf16.msra.mxu0 %v969_v30  ;;  %1028 = vmatprep.subr.bf16.mxu1 %v1027_v43  ;;  %v997_v25 = vpack.c.bf16 %v268_v23, %v265_v22  ;;  %v153_v27 = vld [vmem:[#allocation2 + $0x50] sm:$0xff]  ;;  %v156_v28 = vld [vmem:[#allocation2 + $0x68] sm:$0xff]  ;;  %v155_v29 = vld [vmem:[#allocation2 + $0x60] sm:$0xff] }
  0x4c   :  { %972 = vmatprep.subr.bf16.mxu0 %v971_v35  ;;  %v158_v30 = vld [vmem:[#allocation2 + $0x78] sm:$0xff]  ;;  %v157_v31 = vld [vmem:[#allocation2 + $0x70] sm:$0xff]  ;;  %v160_v32 = vld [vmem:[#allocation2 + $0x88] sm:$0xff] }
  0x4d   :  { %v159_v33 = vld [vmem:[#allocation2 + $0x80] sm:$0xff]  ;;  %v162_v34 = vld [vmem:[#allocation2 + $0x98] sm:$0xff]  ;;  %v161_v35 = vld [vmem:[#allocation2 + $0x90] sm:$0xff] }
  0x4e   :  { %1030 = vmatpush3.bf16.msra.mxu1 %v1029_v51  ;;  %v164_v36 = vld [vmem:[#allocation2 + $0xa8] sm:$0xff]  ;;  %v163_v37 = vld [vmem:[#allocation2 + $0xa0] sm:$0xff]  ;;  %v166_v38 = vld [vmem:[#allocation2 + $0xb8] sm:$0xff] }
  0x4f   :  { %974 = vmatpush1.bf16.msra.mxu0 %v973_v42  ;;  %v165_v39 = vld [vmem:[#allocation2 + $0xb0] sm:$0xff]  ;;  %v168_v40 = vld [vmem:[#allocation2 + $0xc8] sm:$0xff]  ;;  %v167_v41 = vld [vmem:[#allocation2 + $0xc0] sm:$0xff] }
  0x50   :  { %976 = vmatprep.subr.bf16.mxu0 %v975_v46  ;;  %v170_v42 = vld [vmem:[#allocation2 + $0xd8] sm:$0xff]  ;;  %v169_v43 = vld [vmem:[#allocation2 + $0xd0] sm:$0xff]  ;;  %v172_v44 = vld [vmem:[#allocation2 + $0xe8] sm:$0xff] }
  0x51   :  { %497 = vmatmul.mubr.f32.vlgmr.msra.gmra.mrb[0].mxu1 %v143_v58  ;;  %v171_v45 = vld [vmem:[#allocation2 + $0xe0] sm:$0xff]  ;;  %v174_v46 = vld [vmem:[#allocation2 + $0xf8] sm:$0xff]  ;;  %v173_v47 = vld [vmem:[#allocation2 + $0xf0] sm:$0xff] }
  0x52   :  { %501 = vmatprep.mubr.f32.mxu1 %v146_v60  ;;  %v724_v51 = vld [vmem:[%s1239_s2] sm:$0x7]  ;;  %s1117_s2 = smov [#allocation7]  }
  0x53   :  { %978 = vmatpush1.bf16.msra.mxu0 %v977_v52  ;;  %v1168_v55 = vrot.slane %v724_v51, %v736_v50  ;;  %s842_s13 = sshll.u32 %s1117_s2, 4  ;;  %s843_s13 = int_to_ptr.vmem [resolvable:$true] %s842_s13 }
  0x54   :  { %980 = vmatprep.subr.bf16.mxu0 %v979_v53  ;;  %s1083_s14 = scalar_lea.vmem %s843_s13, 6144  ;;  %p1088_p3 = scmp.lt.s32.totalorder %s843_s13, %s843_s13 }
  0x55   :  { %502 = vmatmul.mubr.f32.gmra.mrb[2].mxu1 %v145_v2  ;;  %p1084_p2 = scmp.ne.s32.totalorder %s843_s13, %s1083_s14  ;;  %p1089_p4 = scmp.lt.s32.totalorder %s1083_s14, %s1083_s14 }
  0x56   :  { %506 = vmatprep.mubr.f32.mxu1 %v148_v4 }
  0x57   :  { %982 = vmatpush1.bf16.msra.mxu0 %v981_v59  ;;  %p1090_p5 = por %p1089_p4, %p1088_p3 }
  0x58   :  { %984 = vmatprep.subr.bf16.mxu0 %v983_v61 }
  0x59   :  { %507 = vmatmul.mubr.f32.gmra.mrb[4].mxu1 %v147_v10  ;;  %p1091_p6 = pnand %p1090_p5, %p1084_p2 }
  0x5a   :  { %511 = vmatprep.mubr.f32.mxu1 %v150_v12 }
  0x5b   :  { %986 = vmatpush1.bf16.msra.mxu0 %v985_v3 }
  0x5c   :  { %988 = vmatprep.subr.bf16.mxu0 %v987_v5 }
  0x5d   :  { %512 = vmatmul.mubr.f32.gmra.mrb[6].mxu1 %v149_v18 }
  0x5e   :  { %516 = vmatprep.mubr.f32.mxu1 %v152_v20 }
  0x5f   :  { %990 = vmatpush1.bf16.msra.mxu0 %v989_v11 }
  0x60   :  { %992 = vmatprep.subr.bf16.mxu0 %v991_v13  ;;  %v1176_v13 = vrot.slane %v724_v51, %v732_v6 }
  0x61   :  { %517 = vmatmul.mubr.f32.gmra.mrb[8].mxu1 %v151_v24 }
  0x62   :  { %521 = vmatprep.mubr.f32.mxu1 %v154_v26 }
  0x63   :  { %994 = vmatpush1.bf16.msra.mxu0 %v993_v19 }
  0x64   :  { %996 = vmatprep.subr.bf16.mxu0 %v995_v21 }
  0x65   :  { %522 = vmatmul.mubr.f32.gmra.mrb[10].mxu1 %v153_v27 }
  0x66   :  { %526 = vmatprep.mubr.f32.mxu1 %v156_v28 }
  0x67   :  { %998 = vmatpush1.bf16.msra.mxu0 %v997_v25 }
  0x69   :  { %527 = vmatmul.mubr.f32.gmra.mrb[12].mxu1 %v155_v29 }
  0x6a   :  { %336 = vmatmul.mubr.f32.vlgmr.msra.gmra.mrb[0].mxu0 %v143_v58  ;;  %531 = vmatprep.mubr.f32.mxu1 %v158_v30 }
  0x6b   :  { %341 = vmatprep.mubr.f32.mxu0 %v146_v60 }
  0x6d   :  { %532 = vmatmul.mubr.f32.gmra.mrb[14].mxu1 %v157_v31 }
  0x6e   :  { %342 = vmatmul.mubr.f32.gmra.mrb[2].mxu0 %v145_v2  ;;  %536 = vmatprep.mubr.f32.mxu1 %v160_v32 }
  0x6f   :  { %347 = vmatprep.mubr.f32.mxu0 %v148_v4  ;;  %v728_v4 = vsub.s32 0, %v727_v49 }
  0x71   :  { %537 = vmatmul.mubr.f32.gmra.mrb[16].mxu1 %v159_v33 }
  0x72   :  { %348 = vmatmul.mubr.f32.gmra.mrb[4].mxu0 %v147_v10  ;;  %541 = vmatprep.mubr.f32.mxu1 %v162_v34  ;;  %v1174_v10 = vrot.slane %v724_v51, %v728_v4 }
  0x73   :  { %353 = vmatprep.mubr.f32.mxu0 %v150_v12 }
  0x75   :  { %542 = vmatmul.mubr.f32.gmra.mrb[18].mxu1 %v161_v35 }
  0x76   :  { %354 = vmatmul.mubr.f32.gmra.mrb[6].mxu0 %v149_v18  ;;  %546 = vmatprep.mubr.f32.mxu1 %v164_v36 }
  0x77   :  { %359 = vmatprep.mubr.f32.mxu0 %v152_v20 }
  0x79   :  { %547 = vmatmul.mubr.f32.gmra.mrb[20].mxu1 %v163_v37 }
  0x7a   :  { %360 = vmatmul.mubr.f32.gmra.mrb[8].mxu0 %v151_v24  ;;  %551 = vmatprep.mubr.f32.mxu1 %v166_v38 }
  0x7b   :  { %365 = vmatprep.mubr.f32.mxu0 %v154_v26 }
  0x7d   :  { %552 = vmatmul.mubr.f32.gmra.mrb[22].mxu1 %v165_v39 }
  0x7e   :  { %366 = vmatmul.mubr.f32.gmra.mrb[10].mxu0 %v153_v27  ;;  %556 = vmatprep.mubr.f32.mxu1 %v168_v40 }
  0x7f   :  { %371 = vmatprep.mubr.f32.mxu0 %v156_v28 }
  0x81   :  { %557 = vmatmul.mubr.f32.gmra.mrb[24].mxu1 %v167_v41 }
  0x82   :  { %372 = vmatmul.mubr.f32.gmra.mrb[12].mxu0 %v155_v29  ;;  %561 = vmatprep.mubr.f32.mxu1 %v170_v42 }
  0x83   :  { %377 = vmatprep.mubr.f32.mxu0 %v158_v30 }
  0x85   :  { %562 = vmatmul.mubr.f32.gmra.mrb[26].mxu1 %v169_v43 }
  0x86   :  { %378 = vmatmul.mubr.f32.gmra.mrb[14].mxu0 %v157_v31  ;;  %566 = vmatprep.mubr.f32.mxu1 %v172_v44 }
  0x87   :  { %383 = vmatprep.mubr.f32.mxu0 %v160_v32 }
  0x89   :  { %567 = vmatmul.mubr.f32.gmra.mrb[28].mxu1 %v171_v45 }
  0x8a   :  { %384 = vmatmul.mubr.f32.gmra.mrb[16].mxu0 %v159_v33  ;;  %571 = vmatprep.mubr.f32.mxu1 %v174_v46 }
  0x8b   :  { %389 = vmatprep.mubr.f32.mxu0 %v162_v34 }
  0x8d   :  { %572 = vmatmul.mubr.f32.gmra.mrb[30].mxu1 %v173_v47 }
  0x8e   :  { %390 = vmatmul.mubr.f32.gmra.mrb[18].mxu0 %v161_v35 }
  0x8f   :  { %395 = vmatprep.mubr.f32.mxu0 %v164_v36 }
  0x92   :  { %396 = vmatmul.mubr.f32.gmra.mrb[20].mxu0 %v163_v37 }
  0x93   :  { %401 = vmatprep.mubr.f32.mxu0 %v166_v38 }
  0x96   :  { %402 = vmatmul.mubr.f32.gmra.mrb[22].mxu0 %v165_v39 }
  0x97   :  { %407 = vmatprep.mubr.f32.mxu0 %v168_v40 }
  0x9a   :  { %408 = vmatmul.mubr.f32.gmra.mrb[24].mxu0 %v167_v41 }
  0x9b   :  { %413 = vmatprep.mubr.f32.mxu0 %v170_v42 }
  0x9e   :  { %414 = vmatmul.mubr.f32.gmra.mrb[26].mxu0 %v169_v43 }
  0x9f   :  { %419 = vmatprep.mubr.f32.mxu0 %v172_v44 }
  0xa2   :  { %420 = vmatmul.mubr.f32.gmra.mrb[28].mxu0 %v171_v45 }
  0xa3   :  { %425 = vmatprep.mubr.f32.mxu0 %v174_v46 }
  0xa6   :  { %426 = vmatmul.mubr.f32.gmra.mrb[30].mxu0 %v173_v47 }
 0x124   :  { %v887_v52 = vpop.f32.mrb[0].mxu1 }
 0x125   :  { %v888_v53 = vpop.f32.mrb[1].mxu1 }
 0x126   :  { %v889_v54 = vadd.f32 %v888_v53, %v887_v52 }
 0x128   :  { %v890_v56 = vpop.f32.mrb[2].mxu1  ;;  %v743_v58 = vadd.f32 %v889_v54, %v1168_v55 }
 0x129   :  { %v891_v57 = vpop.f32.mrb[3].mxu1 }
 0x12a   :  { %v892_v59 = vadd.f32 %v891_v57, %v890_v56  ;;  %791 = vst [vmem:[#allocation7 + $0x10] sm:$0xff] %v743_v58 }
 0x12c   :  { %v893_v60 = vpop.f32.mrb[4].mxu1  ;;  %v746_v62 = vadd.f32 %v892_v59, %v1168_v55 }
 0x12d   :  { %v894_v61 = vpop.f32.mrb[5].mxu1 }
 0x12e   :  { %v895_v63 = vadd.f32 %v894_v61, %v893_v60  ;;  %794 = vst [vmem:[#allocation7 + $0x28] sm:$0xff] %v746_v62 }
 0x130   :  { %v896_v0 = vpop.f32.mrb[6].mxu1  ;;  %v749_v2 = vadd.f32 %v895_v63, %v1168_v55 }
 0x131   :  { %v897_v1 = vpop.f32.mrb[7].mxu1 }
 0x132   :  { %v898_v3 = vadd.f32 %v897_v1, %v896_v0  ;;  %797 = vst [vmem:[#allocation7 + $0x40] sm:$0xff] %v749_v2 }
 0x134   :  { %v899_v5 = vpop.f32.mrb[8].mxu1  ;;  %v752_v8 = vadd.f32 %v898_v3, %v1168_v55 }
 0x135   :  { %v900_v7 = vpop.f32.mrb[9].mxu1 }
 0x136   :  { %v901_v9 = vadd.f32 %v900_v7, %v899_v5  ;;  %800 = vst [vmem:[#allocation7 + $0x58] sm:$0xff] %v752_v8 }
 0x138   :  { %v902_v11 = vpop.f32.mrb[10].mxu1  ;;  %v755_v16 = vadd.f32 %v901_v9, %v1168_v55 }
 0x139   :  { %v903_v14 = vpop.f32.mrb[11].mxu1 }
 0x13a   :  { %v904_v17 = vadd.f32 %v903_v14, %v902_v11  ;;  %803 = vst [vmem:[#allocation7 + $0x70] sm:$0xff] %v755_v16 }
 0x13c   :  { %v905_v19 = vpop.f32.mrb[12].mxu1  ;;  %v758_v24 = vadd.f32 %v904_v17, %v1168_v55 }
 0x13d   :  { %v337_v12 = vpop.f32.mrb[0].mxu0  ;;  %v906_v22 = vpop.f32.mrb[13].mxu1 }
 0x13e   :  { %v339_v15 = vpop.f32.mrb[1].mxu0  ;;  %v741_v18 = vadd.f32 %v1174_v10, %v337_v12  ;;  %v907_v25 = vadd.f32 %v906_v22, %v905_v19  ;;  %806 = vst [vmem:[#allocation7 + $0x88] sm:$0xff] %v758_v24 }
 0x13f   :  { %v742_v20 = vadd.f32 %v1176_v13, %v339_v15 }
 0x140   :  { %789 = vst [vmem:[#allocation7] sm:$0xff] %v741_v18  ;;  %v908_v27 = vpop.f32.mrb[14].mxu1  ;;  %v761_v32 = vadd.f32 %v907_v25, %v1168_v55 }
 0x141   :  { %v343_v21 = vpop.f32.mrb[2].mxu0  ;;  %790 = vst [vmem:[#allocation7 + $0x8] sm:$0xff] %v742_v20  ;;  %v909_v30 = vpop.f32.mrb[15].mxu1 }
 0x142   :  { %v345_v23 = vpop.f32.mrb[3].mxu0  ;;  %v744_v26 = vadd.f32 %v1174_v10, %v343_v21  ;;  %v910_v33 = vadd.f32 %v909_v30, %v908_v27  ;;  %809 = vst [vmem:[#allocation7 + $0xa0] sm:$0xff] %v761_v32 }
 0x143   :  { %v745_v28 = vadd.f32 %v1176_v13, %v345_v23 }
 0x144   :  { %792 = vst [vmem:[#allocation7 + $0x18] sm:$0xff] %v744_v26  ;;  %v911_v35 = vpop.f32.mrb[16].mxu1  ;;  %v764_v40 = vadd.f32 %v910_v33, %v1168_v55 }
 0x145   :  { %v349_v29 = vpop.f32.mrb[4].mxu0  ;;  %793 = vst [vmem:[#allocation7 + $0x20] sm:$0xff] %v745_v28  ;;  %v912_v38 = vpop.f32.mrb[17].mxu1 }
 0x146   :  { %v351_v31 = vpop.f32.mrb[5].mxu0  ;;  %v747_v34 = vadd.f32 %v1174_v10, %v349_v29  ;;  %v913_v41 = vadd.f32 %v912_v38, %v911_v35  ;;  %812 = vst [vmem:[#allocation7 + $0xb8] sm:$0xff] %v764_v40 }
 0x147   :  { %v748_v36 = vadd.f32 %v1176_v13, %v351_v31 }
 0x148   :  { %795 = vst [vmem:[#allocation7 + $0x30] sm:$0xff] %v747_v34  ;;  %v914_v43 = vpop.f32.mrb[18].mxu1  ;;  %v767_v48 = vadd.f32 %v913_v41, %v1168_v55 }
 0x149   :  { %v355_v37 = vpop.f32.mrb[6].mxu0  ;;  %796 = vst [vmem:[#allocation7 + $0x38] sm:$0xff] %v748_v36  ;;  %v915_v46 = vpop.f32.mrb[19].mxu1 }
 0x14a   :  { %v357_v39 = vpop.f32.mrb[7].mxu0  ;;  %v750_v42 = vadd.f32 %v1174_v10, %v355_v37  ;;  %v916_v49 = vadd.f32 %v915_v46, %v914_v43  ;;  %815 = vst [vmem:[#allocation7 + $0xd0] sm:$0xff] %v767_v48 }
 0x14b   :  { %v751_v44 = vadd.f32 %v1176_v13, %v357_v39 }
 0x14c   :  { %798 = vst [vmem:[#allocation7 + $0x48] sm:$0xff] %v750_v42  ;;  %v917_v51 = vpop.f32.mrb[20].mxu1  ;;  %v770_v57 = vadd.f32 %v916_v49, %v1168_v55 }
 0x14d   :  { %v361_v45 = vpop.f32.mrb[8].mxu0  ;;  %799 = vst [vmem:[#allocation7 + $0x50] sm:$0xff] %v751_v44  ;;  %v918_v54 = vpop.f32.mrb[21].mxu1 }
 0x14e   :  { %v363_v47 = vpop.f32.mrb[9].mxu0  ;;  %v753_v50 = vadd.f32 %v1174_v10, %v361_v45  ;;  %v919_v58 = vadd.f32 %v918_v54, %v917_v51  ;;  %818 = vst [vmem:[#allocation7 + $0xe8] sm:$0xff] %v770_v57 }
 0x14f   :  { %v754_v52 = vadd.f32 %v1176_v13, %v363_v47 }
 0x150   :  { %801 = vst [vmem:[#allocation7 + $0x60] sm:$0xff] %v753_v50  ;;  %v920_v60 = vpop.f32.mrb[22].mxu1  ;;  %v773_v1 = vadd.f32 %v919_v58, %v1168_v55 }
 0x151   :  { %v367_v53 = vpop.f32.mrb[10].mxu0  ;;  %802 = vst [vmem:[#allocation7 + $0x68] sm:$0xff] %v754_v52  ;;  %v921_v63 = vpop.f32.mrb[23].mxu1 }
 0x152   :  { %v369_v56 = vpop.f32.mrb[11].mxu0  ;;  %v756_v59 = vadd.f32 %v1174_v10, %v367_v53  ;;  %v922_v2 = vadd.f32 %v921_v63, %v920_v60  ;;  %821 = vst [vmem:[#allocation7 + $0x100] sm:$0xff] %v773_v1 }
 0x153   :  { %v757_v61 = vadd.f32 %v1176_v13, %v369_v56 }
 0x154   :  { %804 = vst [vmem:[#allocation7 + $0x78] sm:$0xff] %v756_v59  ;;  %v923_v4 = vpop.f32.mrb[24].mxu1  ;;  %v776_v9 = vadd.f32 %v922_v2, %v1168_v55 }
 0x155   :  { %v373_v62 = vpop.f32.mrb[12].mxu0  ;;  %805 = vst [vmem:[#allocation7 + $0x80] sm:$0xff] %v757_v61  ;;  %v924_v7 = vpop.f32.mrb[25].mxu1 }
 0x156   :  { %v375_v0 = vpop.f32.mrb[13].mxu0  ;;  %v759_v3 = vadd.f32 %v1174_v10, %v373_v62  ;;  %v925_v11 = vadd.f32 %v924_v7, %v923_v4  ;;  %824 = vst [vmem:[#allocation7 + $0x118] sm:$0xff] %v776_v9 }
 0x157   :  { %v760_v5 = vadd.f32 %v1176_v13, %v375_v0 }
 0x158   :  { %807 = vst [vmem:[#allocation7 + $0x90] sm:$0xff] %v759_v3  ;;  %v926_v14 = vpop.f32.mrb[26].mxu1  ;;  %v779_v19 = vadd.f32 %v925_v11, %v1168_v55 }
 0x159   :  { %v379_v6 = vpop.f32.mrb[14].mxu0  ;;  %808 = vst [vmem:[#allocation7 + $0x98] sm:$0xff] %v760_v5  ;;  %v927_v17 = vpop.f32.mrb[27].mxu1 }
 0x15a   :  { %v381_v8 = vpop.f32.mrb[15].mxu0  ;;  %v762_v12 = vadd.f32 %v1174_v10, %v379_v6  ;;  %v928_v20 = vadd.f32 %v927_v17, %v926_v14  ;;  %827 = vst [vmem:[#allocation7 + $0x130] sm:$0xff] %v779_v19 }
 0x15b   :  { %v763_v15 = vadd.f32 %v1176_v13, %v381_v8 }
 0x15c   :  { %810 = vst [vmem:[#allocation7 + $0xa8] sm:$0xff] %v762_v12  ;;  %v929_v22 = vpop.f32.mrb[28].mxu1  ;;  %v782_v27 = vadd.f32 %v928_v20, %v1168_v55 }
 0x15d   :  { %v385_v16 = vpop.f32.mrb[16].mxu0  ;;  %811 = vst [vmem:[#allocation7 + $0xb0] sm:$0xff] %v763_v15  ;;  %v930_v25 = vpop.f32.mrb[29].mxu1 }
 0x15e   :  { %v387_v18 = vpop.f32.mrb[17].mxu0  ;;  %v765_v21 = vadd.f32 %v1174_v10, %v385_v16  ;;  %v931_v28 = vadd.f32 %v930_v25, %v929_v22  ;;  %830 = vst [vmem:[#allocation7 + $0x148] sm:$0xff] %v782_v27 }
 0x15f   :  { %v766_v23 = vadd.f32 %v1176_v13, %v387_v18 }
 0x160   :  { %813 = vst [vmem:[#allocation7 + $0xc0] sm:$0xff] %v765_v21  ;;  %v932_v30 = vpop.f32.mrb[30].mxu1  ;;  %v785_v35 = vadd.f32 %v931_v28, %v1168_v55 }
 0x161   :  { %v391_v24 = vpop.f32.mrb[18].mxu0  ;;  %814 = vst [vmem:[#allocation7 + $0xc8] sm:$0xff] %v766_v23  ;;  %v933_v33 = vpop.f32.mrb[31].mxu1 }
 0x162   :  { %v393_v26 = vpop.f32.mrb[19].mxu0  ;;  %v768_v29 = vadd.f32 %v1174_v10, %v391_v24  ;;  %v934_v36 = vadd.f32 %v933_v33, %v932_v30  ;;  %833 = vst [vmem:[#allocation7 + $0x160] sm:$0xff] %v785_v35 }
 0x163   :  { %v769_v31 = vadd.f32 %v1176_v13, %v393_v26 }
 0x164   :  { %816 = vst [vmem:[#allocation7 + $0xd8] sm:$0xff] %v768_v29  ;;  %v788_v41 = vadd.f32 %v934_v36, %v1168_v55 }
 0x165   :  { %v397_v32 = vpop.f32.mrb[20].mxu0  ;;  %817 = vst [vmem:[#allocation7 + $0xe0] sm:$0xff] %v769_v31 }
 0x166   :  { %v399_v34 = vpop.f32.mrb[21].mxu0  ;;  %v771_v37 = vadd.f32 %v1174_v10, %v397_v32  ;;  %836 = vst [vmem:[#allocation7 + $0x178] sm:$0xff] %v788_v41 }
 0x167   :  { %v772_v38 = vadd.f32 %v1176_v13, %v399_v34 }
 0x168   :  { %819 = vst [vmem:[#allocation7 + $0xf0] sm:$0xff] %v771_v37 }
 0x169   :  { %v403_v39 = vpop.f32.mrb[22].mxu0  ;;  %820 = vst [vmem:[#allocation7 + $0xf8] sm:$0xff] %v772_v38 }
 0x16a   :  { %v405_v40 = vpop.f32.mrb[23].mxu0  ;;  %v774_v42 = vadd.f32 %v1174_v10, %v403_v39 }
 0x16b   :  { %v775_v43 = vadd.f32 %v1176_v13, %v405_v40 }
 0x16c   :  { %822 = vst [vmem:[#allocation7 + $0x108] sm:$0xff] %v774_v42 }
 0x16d   :  { %v409_v44 = vpop.f32.mrb[24].mxu0  ;;  %823 = vst [vmem:[#allocation7 + $0x110] sm:$0xff] %v775_v43 }
 0x16e   :  { %v411_v45 = vpop.f32.mrb[25].mxu0  ;;  %v777_v46 = vadd.f32 %v1174_v10, %v409_v44 }
 0x16f   :  { %v778_v47 = vadd.f32 %v1176_v13, %v411_v45 }
 0x170   :  { %825 = vst [vmem:[#allocation7 + $0x120] sm:$0xff] %v777_v46 }
 0x171   :  { %v415_v48 = vpop.f32.mrb[26].mxu0  ;;  %826 = vst [vmem:[#allocation7 + $0x128] sm:$0xff] %v778_v47 }
 0x172   :  { %v417_v49 = vpop.f32.mrb[27].mxu0  ;;  %v780_v55 = vadd.f32 %v1174_v10, %v415_v48 }
 0x173   :  { %v781_v50 = vadd.f32 %v1176_v13, %v417_v49 }
 0x174   :  { %828 = vst [vmem:[#allocation7 + $0x138] sm:$0xff] %v780_v55 }
 0x175   :  { %v421_v51 = vpop.f32.mrb[28].mxu0  ;;  %829 = vst [vmem:[#allocation7 + $0x140] sm:$0xff] %v781_v50 }
 0x176   :  { %v423_v52 = vpop.f32.mrb[29].mxu0  ;;  %v783_v53 = vadd.f32 %v1174_v10, %v421_v51 }
 0x177   :  { %v784_v54 = vadd.f32 %v1176_v13, %v423_v52 }
 0x178   :  { %831 = vst [vmem:[#allocation7 + $0x150] sm:$0xff] %v783_v53 }
 0x179   :  { %v427_v56 = vpop.f32.mrb[30].mxu0  ;;  %832 = vst [vmem:[#allocation7 + $0x158] sm:$0xff] %v784_v54 }
 0x17a   :  { %v429_v57 = vpop.f32.mrb[31].mxu0  ;;  %v786_v58 = vadd.f32 %v1174_v10, %v427_v56 }
 0x17b   :  { %v787_v59 = vadd.f32 %v1176_v13, %v429_v57 }
 0x17c   :  { %834 = vst [vmem:[#allocation7 + $0x168] sm:$0xff] %v786_v58 }
 0x17d   :  { %835 = vst [vmem:[#allocation7 + $0x170] sm:$0xff] %v787_v59 }
 0x17e   :  { %1094 = shalt.err (!%p1091_p6)
}
 0x17f   :  { %s1095_s17 = scalar_lea.hbm %s1240_s3, 6144 }
 0x180   :  { %p1096_p7 = scmp.ne.s32.totalorder %s1240_s3, %s1095_s17  ;;  %p1099_p8 = scmp.lt.u32.totalorder %s1095_s17, %s1240_s3 }
 0x182   :  { %p1101_p9 = pnand %p1099_p8, %p1096_p7 }
 0x184   :  { %1104 = shalt.err (!%p1101_p9)
}
 0x185   :  { %848 = dma.vmem_to_hbm [thread:$0]  %s843_s13, 6144, %s1240_s3, [#allocation4], %s1115_s0, %s1115_s0, %s1116_s9  }
 0x186   :  { %1109 = dma.done.wait [#allocation4], 6144  }
 0x187   :  { %1110 = vsyncadd [#allocation4], 4294961152 }
 0x188   :  { %852 = vsyncpa [#allocation3], 1 }
 0x189   :  { %853 = vsyncpa [#allocation6], 1 }
 0x18a   :  { %854 = vsyncpa [#allocation4], 1 }

</bundles_post_ra>
